<compile_context>
chip_gen: v7x
topology: tpu7x:2x2x1
jax: 0.10.0
libtpu: 0.0.40
codegen_flags: <defaults>
</compile_context>

<pallas_src>
import functools

import jax
import jax.numpy as jnp
from jax import lax
from jax.experimental import pallas as pl
from jax.experimental.pallas import tpu as pltpu


def fusion_kernel(aasist_ref, ser_ref, gamma_a_ref, gamma_s_ref,
                  beta_a_ref, beta_s_ref, w_a_ref, w_s_ref, b_ref,
                  combined_ref, out_ref, *, d1, d_total):
    a = aasist_ref[...].astype(jnp.float32)       # [TB, D1]
    s = ser_ref[...].astype(jnp.float32)          # [TB, D2]

    # LayerNorm statistics of cat([a, s], -1) from split partial sums
    # (biased variance, eps = 1e-5, matching nn.LayerNorm). Two-pass form
    # kept for numerical safety.
    inv_d = jnp.float32(1.0 / d_total)
    mean = (jnp.sum(a, axis=-1, keepdims=True)
            + jnp.sum(s, axis=-1, keepdims=True)) * inv_d
    ac = a - mean
    sc = s - mean
    var = (jnp.sum(ac * ac, axis=-1, keepdims=True)
           + jnp.sum(sc * sc, axis=-1, keepdims=True)) * inv_d
    rstd = lax.rsqrt(var + jnp.float32(1e-5))

    na = ac * rstd * gamma_a_ref[...] + beta_a_ref[...]   # [TB, D1]
    ns = sc * rstd * gamma_s_ref[...] + beta_s_ref[...]   # [TB, D2]

    # Two stores instead of an in-kernel concat; the unaligned boundary
    # (D1 = 160) is confined to these stores.
    combined_ref[:, :d1] = na.astype(combined_ref.dtype)
    combined_ref[:, d1:] = ns.astype(combined_ref.dtype)

    # nn.Linear(D, 2) on the MXU (weights pre-transposed in the wrapper):
    # one (TB, D1)x(D1, 2) + one (TB, D2)x(D2, 2) dot, single unmasked store.
    logits = (jnp.dot(na, w_a_ref[...], preferred_element_type=jnp.float32)
              + jnp.dot(ns, w_s_ref[...], preferred_element_type=jnp.float32)
              + b_ref[...])
    out_ref[...] = logits.astype(out_ref.dtype)


def _batch_dim_semantics(num_blocks):
    """CORE_PARALLEL on v7x-class (2 TC/chip) parts, plain 'parallel' elsewhere."""
    core_parallel = getattr(pltpu, "CORE_PARALLEL", None)
    if core_parallel is None or num_blocks < 2:
        return ("parallel",)
    try:
        kind = jax.devices()[0].device_kind.lower()
    except Exception:
        kind = ""
    if "7" in kind:
        return (core_parallel,)
    return ("parallel",)


def aasist_with_emotion_head(aasist_feat, ser_feat, gamma, beta, weight, bias,
                             *, block_b=None, combined_dtype=jnp.float32,
                             min_rows_for_pallas=0):
    """Pallas fusion head: (combined, logits) = LN(cat(a, s)); Linear(combined).

    weight is in PyTorch nn.Linear layout [n_cls, D]; bias is [n_cls].
    """
    B, D1 = aasist_feat.shape
    D2 = ser_feat.shape[1]
    D = D1 + D2
    n_cls = weight.shape[0]

    # Small-batch escape hatch: for tiny post-backbone batches the fixed
    # custom-call + DMA setup overhead can exceed the fused XLA HLO.
    if B < min_rows_for_pallas:
        c, o = reference_head(aasist_feat, ser_feat, gamma, beta, weight, bias)
        return c.astype(combined_dtype), o

    # Batch tile: big tiles amortize the ~0.35 us per-grid-step overhead for
    # this HBM-bound head.  2048 rows double-buffered is ~19 MiB of VMEM, so
    # scoped VMEM is raised to 32 MiB (safe on v5e/v6e/v7x).
    if block_b is None:
        block_b = 2048
    block_b = min(block_b, B)
    if block_b < B:
        block_b = max(8, (block_b // 8) * 8)   # (8,128) sublane rule
    grid_b = pl.cdiv(B, block_b)
    grid = (grid_b,)

    # Pre-split / pre-transpose parameters so the kernel never touches the
    # unaligned boundary except at the combined-output store, and the
    # classifier dot needs no in-kernel transpose (these run once in XLA).
    gamma_a = gamma[:D1].reshape(1, D1)
    gamma_s = gamma[D1:].reshape(1, D2)
    beta_a = beta[:D1].reshape(1, D1)
    beta_s = beta[D1:].reshape(1, D2)
    w_a_t = weight[:, :D1].T                 # [D1, n_cls]
    w_s_t = weight[:, D1:].T                 # [D2, n_cls]
    b2 = bias.reshape(1, n_cls)              # tiny resident VMEM tile

    kernel = functools.partial(fusion_kernel, d1=D1, d_total=D)

    batched = lambda shape: pl.BlockSpec(shape, lambda i: (i, 0))
    resident = lambda shape: pl.BlockSpec(shape, lambda i: (0, 0))

    cost = pl.CostEstimate(
        flops=2 * B * D * n_cls + 10 * B * D,
        transcendentals=B,  # one rsqrt per row
        bytes_accessed=4 * (B * (D1 + D2 + n_cls) + 2 * D + n_cls * (D + 1))
                       + jnp.dtype(combined_dtype).itemsize * B * D,
    )

    def call(dim_sems):
        return pl.pallas_call(
            kernel,
            out_shape=(
                jax.ShapeDtypeStruct((B, D), combined_dtype),    # combined
                jax.ShapeDtypeStruct((B, n_cls), jnp.float32),   # logits
            ),
            grid=grid,
            in_specs=[
                batched((block_b, D1)),
                batched((block_b, D2)),
                resident((1, D1)),
                resident((1, D2)),
                resident((1, D1)),
                resident((1, D2)),
                resident((D1, n_cls)),
                resident((D2, n_cls)),
                resident((1, n_cls)),
            ],
            out_specs=(batched((block_b, D)), batched((block_b, n_cls))),
            compiler_params=pltpu.CompilerParams(
                dimension_semantics=dim_sems,
                vmem_limit_bytes=32 * 1024 * 1024),
            cost_estimate=cost,
        )(aasist_feat, ser_feat, gamma_a, gamma_s, beta_a, beta_s,
          w_a_t, w_s_t, b2)

    dim_sems = _batch_dim_semantics(grid_b)
    try:
        return call(dim_sems)
    except Exception:
        if dim_sems != ("parallel",):
            return call(("parallel",))   # conservative fallback
        raise


def reference_head(aasist_feat, ser_feat, gamma, beta, weight, bias):
    c = jnp.concatenate([aasist_feat, ser_feat], axis=-1).astype(jnp.float32)
    mean = jnp.mean(c, axis=-1, keepdims=True)
    var = jnp.mean((c - mean) ** 2, axis=-1, keepdims=True)
    y = (c - mean) / jnp.sqrt(var + 1e-5) * gamma + beta
    return y, y @ weight.T + bias


def _run_case(key, B, block_b, aasist_feat_dim, ser_feat_dim, n_cls):
    k1, k2, k3, k4 = jax.random.split(key, 4)
    D = aasist_feat_dim + ser_feat_dim

    # TODO(synk): stand-in features for the frozen AASIST / SER backbones.
    aasist_feat = jax.random.normal(k1, (B, aasist_feat_dim), dtype=jnp.float32)
    ser_feat = jax.random.normal(k2, (B, ser_feat_dim), dtype=jnp.float32)

    # nn.LayerNorm(D): gamma = 1, beta = 0; nn.Linear(D, 2): weight [2, D], bias [2]
    gamma = jnp.ones((D,), dtype=jnp.float32)
    beta = jnp.zeros((D,), dtype=jnp.float32)
    weight = jax.random.normal(k3, (n_cls, D), dtype=jnp.float32) * 0.02
    bias = jax.random.normal(k4, (n_cls,), dtype=jnp.float32) * 0.01

    combined, logits = aasist_with_emotion_head(
        aasist_feat, ser_feat, gamma, beta, weight, bias, block_b=block_b)
    jax.block_until_ready((combined, logits))

    ref_combined, ref_logits = reference_head(
        aasist_feat, ser_feat, gamma, beta, weight, bias)
    assert combined.shape == (B, D) and logits.shape == (B, n_cls)
    assert jnp.allclose(combined, ref_combined, atol=1e-4, rtol=1e-4)
    assert jnp.allclose(logits, ref_logits, atol=1e-4, rtol=1e-4)


if __name__ == "__main__":
    # Shapes consistent with the module: gat_dims[1] = 32 -> aasist dim = 160,
    # ser dim fixed at 256, 2 classes.
    aasist_feat_dim = 5 * 32
    ser_feat_dim = 256
    n_cls = 2

    key = jax.random.PRNGKey(0)
    ka, kb = jax.random.split(key)

    # Small-batch case (single grid step; block_b capped at B).
    _run_case(ka, B=2, block_b=None,
              aasist_feat_dim=aasist_feat_dim, ser_feat_dim=ser_feat_dim,
              n_cls=n_cls)
    # Batched case exercising the pipelined batch grid (grid = (2,)).
    _run_case(kb, B=16, block_b=8,
              aasist_feat_dim=aasist_feat_dim, ser_feat_dim=ser_feat_dim,
              n_cls=n_cls)

    print("KERNEL_OK")
</pallas_src>

<mosaic_0001>
module attributes {stable_mosaic.version = 11 : i64} {
  func.func @fusion_kernel(%arg0: i32, %arg1: memref<2x160xf32, #tpu.memory_space<vmem>>, %arg2: memref<2x256xf32, #tpu.memory_space<vmem>>, %arg3: memref<1x160xf32, #tpu.memory_space<vmem>>, %arg4: memref<1x256xf32, #tpu.memory_space<vmem>>, %arg5: memref<1x160xf32, #tpu.memory_space<vmem>>, %arg6: memref<1x256xf32, #tpu.memory_space<vmem>>, %arg7: memref<160x2xf32, #tpu.memory_space<vmem>>, %arg8: memref<256x2xf32, #tpu.memory_space<vmem>>, %arg9: memref<1x2xf32, #tpu.memory_space<vmem>>, %arg10: memref<2x416xf32, #tpu.memory_space<vmem>>, %arg11: memref<2x2xf32, #tpu.memory_space<vmem>>) attributes {dimension_semantics = [#tpu.dimension_semantics<parallel>], iteration_bounds = array<i64: 1>, scalar_prefetch = 0 : i64, scratch_operands = 0 : i64, tpu.core_type = #tpu.core_type<tc>, window_params = [{transform_indices = @transform_0, window_bounds = array<i64: 2, 160>}, {transform_indices = @transform_1, window_bounds = array<i64: 2, 256>}, {pipeline_mode = #tpu.pipeline_mode<synchronous>, transform_indices = @transform_2, window_bounds = array<i64: 1, 160>}, {pipeline_mode = #tpu.pipeline_mode<synchronous>, transform_indices = @transform_3, window_bounds = array<i64: 1, 256>}, {pipeline_mode = #tpu.pipeline_mode<synchronous>, transform_indices = @transform_4, window_bounds = array<i64: 1, 160>}, {pipeline_mode = #tpu.pipeline_mode<synchronous>, transform_indices = @transform_5, window_bounds = array<i64: 1, 256>}, {pipeline_mode = #tpu.pipeline_mode<synchronous>, transform_indices = @transform_6, window_bounds = array<i64: 160, 2>}, {pipeline_mode = #tpu.pipeline_mode<synchronous>, transform_indices = @transform_7, window_bounds = array<i64: 256, 2>}, {pipeline_mode = #tpu.pipeline_mode<synchronous>, transform_indices = @transform_8, window_bounds = array<i64: 1, 2>}, {transform_indices = @transform_9, window_bounds = array<i64: 2, 416>}, {transform_indices = @transform_10, window_bounds = array<i64: 2, 2>}]} {
    %c0 = arith.constant 0 : index
    %c0_0 = arith.constant 0 : index
    %0 = vector.load %arg1[%c0, %c0_0] : memref<2x160xf32, #tpu.memory_space<vmem>>, vector<2x160xf32>
    %c0_1 = arith.constant 0 : index
    %c0_2 = arith.constant 0 : index
    %1 = vector.load %arg2[%c0_1, %c0_2] : memref<2x256xf32, #tpu.memory_space<vmem>>, vector<2x256xf32>
    %cst = arith.constant dense<0.000000e+00> : vector<2xf32>
    %2 = vector.multi_reduction <add>, %0, %cst [1] : vector<2x160xf32> to vector<2xf32>
    %3 = vector.shape_cast %2 : vector<2xf32> to vector<2x1xf32>
    %cst_3 = arith.constant dense<0.000000e+00> : vector<2xf32>
    %4 = vector.multi_reduction <add>, %1, %cst_3 [1] : vector<2x256xf32> to vector<2xf32>
    %5 = vector.shape_cast %4 : vector<2xf32> to vector<2x1xf32>
    %6 = arith.addf %3, %5 : vector<2x1xf32>
    %cst_4 = arith.constant 0.00240384624 : f32
    %7 = vector.broadcast %cst_4 : f32 to vector<2x1xf32>
    %8 = arith.mulf %6, %7 : vector<2x1xf32>
    %9 = vector.broadcast %8 : vector<2x1xf32> to vector<2x160xf32>
    %10 = arith.subf %0, %9 : vector<2x160xf32>
    %11 = vector.broadcast %8 : vector<2x1xf32> to vector<2x256xf32>
    %12 = arith.subf %1, %11 : vector<2x256xf32>
    %13 = arith.mulf %10, %10 : vector<2x160xf32>
    %cst_5 = arith.constant dense<0.000000e+00> : vector<2xf32>
    %14 = vector.multi_reduction <add>, %13, %cst_5 [1] : vector<2x160xf32> to vector<2xf32>
    %15 = vector.shape_cast %14 : vector<2xf32> to vector<2x1xf32>
    %16 = arith.mulf %12, %12 : vector<2x256xf32>
    %cst_6 = arith.constant dense<0.000000e+00> : vector<2xf32>
    %17 = vector.multi_reduction <add>, %16, %cst_6 [1] : vector<2x256xf32> to vector<2xf32>
    %18 = vector.shape_cast %17 : vector<2xf32> to vector<2x1xf32>
    %19 = arith.addf %15, %18 : vector<2x1xf32>
    %cst_7 = arith.constant 0.00240384624 : f32
    %20 = vector.broadcast %cst_7 : f32 to vector<2x1xf32>
    %21 = arith.mulf %19, %20 : vector<2x1xf32>
    %cst_8 = arith.constant 9.99999974E-6 : f32
    %22 = vector.broadcast %cst_8 : f32 to vector<2x1xf32>
    %23 = arith.addf %21, %22 : vector<2x1xf32>
    %24 = math.rsqrt %23 : vector<2x1xf32>
    %25 = vector.broadcast %24 : vector<2x1xf32> to vector<2x160xf32>
    %26 = arith.mulf %10, %25 : vector<2x160xf32>
    %c0_9 = arith.constant 0 : index
    %c0_10 = arith.constant 0 : index
    %27 = vector.load %arg3[%c0_9, %c0_10] : memref<1x160xf32, #tpu.memory_space<vmem>>, vector<1x160xf32>
    %28 = vector.broadcast %27 : vector<1x160xf32> to vector<2x160xf32>
    %29 = arith.mulf %26, %28 : vector<2x160xf32>
    %c0_11 = arith.constant 0 : index
    %c0_12 = arith.constant 0 : index
    %30 = vector.load %arg5[%c0_11, %c0_12] : memref<1x160xf32, #tpu.memory_space<vmem>>, vector<1x160xf32>
    %31 = vector.broadcast %30 : vector<1x160xf32> to vector<2x160xf32>
    %32 = arith.addf %29, %31 : vector<2x160xf32>
    %33 = vector.broadcast %24 : vector<2x1xf32> to vector<2x256xf32>
    %34 = arith.mulf %12, %33 : vector<2x256xf32>
    %c0_13 = arith.constant 0 : index
    %c0_14 = arith.constant 0 : index
    %35 = vector.load %arg4[%c0_13, %c0_14] : memref<1x256xf32, #tpu.memory_space<vmem>>, vector<1x256xf32>
    %36 = vector.broadcast %35 : vector<1x256xf32> to vector<2x256xf32>
    %37 = arith.mulf %34, %36 : vector<2x256xf32>
    %c0_15 = arith.constant 0 : index
    %c0_16 = arith.constant 0 : index
    %38 = vector.load %arg6[%c0_15, %c0_16] : memref<1x256xf32, #tpu.memory_space<vmem>>, vector<1x256xf32>
    %39 = vector.broadcast %38 : vector<1x256xf32> to vector<2x256xf32>
    %40 = arith.addf %37, %39 : vector<2x256xf32>
    %c0_17 = arith.constant 0 : index
    %c0_18 = arith.constant 0 : index
    %41 = vector.load %arg10[%c0_17, %c0_18] : memref<2x416xf32, #tpu.memory_space<vmem>>, vector<2x160xf32>
    tpu.vector_store %arg10[%c0_17, %c0_18], %32 {strides = array<i32>} : memref<2x416xf32, #tpu.memory_space<vmem>>, vector<2x160xf32>,
    %c0_19 = arith.constant 0 : index
    %c160 = arith.constant 160 : index
    %42 = vector.load %arg10[%c0_19, %c160] : memref<2x416xf32, #tpu.memory_space<vmem>>, vector<2x256xf32>
    tpu.vector_store %arg10[%c0_19, %c160], %40 {strides = array<i32>} : memref<2x416xf32, #tpu.memory_space<vmem>>, vector<2x256xf32>,
    %c0_20 = arith.constant 0 : index
    %c0_21 = arith.constant 0 : index
    %43 = vector.load %arg7[%c0_20, %c0_21] : memref<160x2xf32, #tpu.memory_space<vmem>>, vector<160x2xf32>
    %cst_22 = arith.constant dense<0.000000e+00> : vector<2x2xf32>
    %44 = tpu.matmul %32, %43, %cst_22 {dimension_numbers = #tpu.dot_dimension_numbers<[1], [0], [0], [1], [0, 0, 1, 1], [], []>} : vector<2x160xf32>, vector<160x2xf32>, vector<2x2xf32> -> vector<2x2xf32>
    %c0_23 = arith.constant 0 : index
    %c0_24 = arith.constant 0 : index
    %45 = vector.load %arg8[%c0_23, %c0_24] : memref<256x2xf32, #tpu.memory_space<vmem>>, vector<256x2xf32>
    %cst_25 = arith.constant dense<0.000000e+00> : vector<2x2xf32>
    %46 = tpu.matmul %40, %45, %cst_25 {dimension_numbers = #tpu.dot_dimension_numbers<[1], [0], [0], [1], [0, 0, 1, 1], [], []>} : vector<2x256xf32>, vector<256x2xf32>, vector<2x2xf32> -> vector<2x2xf32>
    %47 = arith.addf %44, %46 : vector<2x2xf32>
    %c0_26 = arith.constant 0 : index
    %c0_27 = arith.constant 0 : index
    %48 = vector.load %arg9[%c0_26, %c0_27] : memref<1x2xf32, #tpu.memory_space<vmem>>, vector<1x2xf32>
    %49 = vector.broadcast %48 : vector<1x2xf32> to vector<2x2xf32>
    %50 = arith.addf %47, %49 : vector<2x2xf32>
    %c0_28 = arith.constant 0 : index
    %c0_29 = arith.constant 0 : index
    %51 = vector.load %arg11[%c0_28, %c0_29] : memref<2x2xf32, #tpu.memory_space<vmem>>, vector<2x2xf32>
    tpu.vector_store %arg11[%c0_28, %c0_29], %50 {strides = array<i32>} : memref<2x2xf32, #tpu.memory_space<vmem>>, vector<2x2xf32>,
    return
  }
  func.func @transform_0(%arg0: i32) -> (i32, i32) {
    %c0_i32 = arith.constant 0 : i32
    %c0_i32_0 = arith.constant 0 : i32
    return %arg0, %c0_i32 : i32, i32
  }
  func.func @transform_1(%arg0: i32) -> (i32, i32) {
    %c0_i32 = arith.constant 0 : i32
    %c0_i32_0 = arith.constant 0 : i32
    return %arg0, %c0_i32 : i32, i32
  }
  func.func @transform_2(%arg0: i32) -> (i32, i32) {
    %c0_i32 = arith.constant 0 : i32
    %c0_i32_0 = arith.constant 0 : i32
    %c0_i32_1 = arith.constant 0 : i32
    return %c0_i32, %c0_i32_0 : i32, i32
  }
  func.func @transform_3(%arg0: i32) -> (i32, i32) {
    %c0_i32 = arith.constant 0 : i32
    %c0_i32_0 = arith.constant 0 : i32
    %c0_i32_1 = arith.constant 0 : i32
    return %c0_i32, %c0_i32_0 : i32, i32
  }
  func.func @transform_4(%arg0: i32) -> (i32, i32) {
    %c0_i32 = arith.constant 0 : i32
    %c0_i32_0 = arith.constant 0 : i32
    %c0_i32_1 = arith.constant 0 : i32
    return %c0_i32, %c0_i32_0 : i32, i32
  }
  func.func @transform_5(%arg0: i32) -> (i32, i32) {
    %c0_i32 = arith.constant 0 : i32
    %c0_i32_0 = arith.constant 0 : i32
    %c0_i32_1 = arith.constant 0 : i32
    return %c0_i32, %c0_i32_0 : i32, i32
  }
  func.func @transform_6(%arg0: i32) -> (i32, i32) {
    %c0_i32 = arith.constant 0 : i32
    %c0_i32_0 = arith.constant 0 : i32
    %c0_i32_1 = arith.constant 0 : i32
    return %c0_i32, %c0_i32_0 : i32, i32
  }
  func.func @transform_7(%arg0: i32) -> (i32, i32) {
    %c0_i32 = arith.constant 0 : i32
    %c0_i32_0 = arith.constant 0 : i32
    %c0_i32_1 = arith.constant 0 : i32
    return %c0_i32, %c0_i32_0 : i32, i32
  }
  func.func @transform_8(%arg0: i32) -> (i32, i32) {
    %c0_i32 = arith.constant 0 : i32
    %c0_i32_0 = arith.constant 0 : i32
    %c0_i32_1 = arith.constant 0 : i32
    return %c0_i32, %c0_i32_0 : i32, i32
  }
  func.func @transform_9(%arg0: i32) -> (i32, i32) {
    %c0_i32 = arith.constant 0 : i32
    %c0_i32_0 = arith.constant 0 : i32
    return %arg0, %c0_i32 : i32, i32
  }
  func.func @transform_10(%arg0: i32) -> (i32, i32) {
    %c0_i32 = arith.constant 0 : i32
    %c0_i32_0 = arith.constant 0 : i32
    return %arg0, %c0_i32 : i32, i32
  }
}

</mosaic_0001>

<bundles_post_ra>
// kernel: tpu_custom_call.1
= control target key start
LH: loop header
LB: loop body
LE: loop exit
PB: predicated region body
PF: predicated region fallthrough
CT: control target
= control target key end

     0   :  { %16 = vsyncpa [#allocation3], 0  ;;  %v42_v0 = vlaneseq  ;;  %v637_v1 = vmov 1983009808   ;;  %s952_s0 = inlined_call_operand.vmem [shape: f32[2,160], index: 0, kind: input, shape index: {}]   ;;  %s953_s1 = inlined_call_operand.vmem [shape: f32[2,256], index: 1, kind: input, shape index: {}]   ;;  %s954_s2 = inlined_call_operand.vmem [shape: f32[1,160], index: 2, kind: input, shape index: {}]   ;;  %s955_s3 = inlined_call_operand.vmem [shape: f32[1,256], index: 3, kind: input, shape index: {}]   ;;  %s956_s4 = inlined_call_operand.vmem [shape: f32[1,160], index: 4, kind: input, shape index: {}]   ;;  %s957_s5 = inlined_call_operand.vmem [shape: f32[1,256], index: 5, kind: input, shape index: {}]   ;;  %s958_s6 = inlined_call_operand.vmem [shape: f32[160,2], index: 6, kind: input, shape index: {}]   ;;  %s959_s7 = inlined_call_operand.vmem [shape: f32[256,2], index: 7, kind: input, shape index: {}]   ;;  %s960_s8 = inlined_call_operand.vmem [shape: f32[1,2], index: 8, kind: input, shape index: {}]   ;;  %s961_s9 = inlined_call_operand.hbm [shape: f32[2,416], index: 9, kind: output, shape index: {0}]   ;;  %s962_s10 = inlined_call_operand.hbm [shape: f32[2,2], index: 10, kind: output, shape index: {1}]  }
   0x1   :  { %v40_v2 = vunpack.c.l.s4 %v637_v1 }
   0x2   :  { %17 = vsyncpa [#allocation5], 0  ;;  %v698_v3 = vshrl.u32 %v42_v0, 7  ;;  %v36_v5 = vld [vmem:[%s952_s0] sm:$0xf]  ;;  %vm49_vm0 = vcmask 1041408  }
   0x3   :  { %v41_v4 = vunpack.c.0.s8 %v40_v2  ;;  %v37_v6 = vld [vmem:[%s953_s1] sm:$0xf]  ;;  %vm51_vm1 = vcmask 254976   ;;  %v231_v19 = vld [vmem:[%s958_s6 + $0x8] sm:$0xff]  ;;  %v232_v20 = vld [vmem:[%s958_s6 + $0x10] sm:$0xff]  ;;  %v638_v21 = vmov 0.0|0.0  }
   0x4   :  { %v230_v18 = vld [vmem:[%s958_s6] sm:$0xff]  ;;  %551 = vmatprep.subr.bf16.mxu1 %v638_v21  ;;  %v233_v23 = vld [vmem:[%s958_s6 + $0x18] sm:$0xff]  ;;  %v639_v25 = vmov 269488144   ;;  %v267_v49 = vld [vmem:[%s959_s7 + $0x88] sm:$0xff]  ;;  %vm214_vm2 = vcmask 257026  }
   0x5   :  { %v707_v7 = vsub.s32 %v41_v4, %v698_v3  ;;  %v552_v22 = vpack.c.bf16 %v231_v19, %v230_v18  ;;  %v555_v24 = vpack.c.bf16 %v233_v23, %v232_v20  ;;  %v76_v26 = vunpack.c.l.s4 %v639_v25  ;;  %v266_v48 = vld [vmem:[%s959_s7 + $0x80] sm:$0xff]  ;;  %v251_v52 = vld [vmem:[%s959_s7 + $0x8] sm:$0xff]  ;;  %v268_v57 = vld [vmem:[%s959_s7 + $0x90] sm:$0xff] }
   0x6   :  { %v250_v50 = vld [vmem:[%s959_s7] sm:$0xff]  ;;  %v519_v51 = vpack.c.bf16 %v267_v49, %v266_v48  ;;  %v235_v54 = vld [vmem:[%s958_s6 + $0x28] sm:$0xff]  ;;  %v269_v58 = vld [vmem:[%s959_s7 + $0x98] sm:$0xff]  ;;  %vm221_vm4 = vcmask 261120   ;;  %vm224_vm5 = vcmask 1041664   ;;  %vm225_vm6 = vcmask 1043458  }
   0x7   :  { %v45_v8 = vrot.slane %v36_v5, %v707_v7  ;;  %v63_v9 = vrot.slane %v37_v6, %v707_v7  ;;  %553 = vmatpush1.bf16.msra.mxu1 %v552_v22  ;;  %v77_v28 = vunpack.c.0.s8 %v76_v26  ;;  %v234_v53 = vld [vmem:[%s958_s6 + $0x20] sm:$0xff]  ;;  %v521_v55 = vpack.c.bf16 %v251_v52, %v250_v50  ;;  %v252_v60 = vld [vmem:[%s959_s7 + $0x10] sm:$0xff]  ;;  %v253_v61 = vld [vmem:[%s959_s7 + $0x18] sm:$0xff] }
   0x8   :  { %554 = vmatprep.subr.bf16.mxu1 %v638_v21  ;;  %v558_v56 = vpack.c.bf16 %v235_v54, %v234_v53  ;;  %520 = vmatprep.subr.bf16.mxu0 %v519_v51  ;;  %v523_v59 = vpack.c.bf16 %v269_v58, %v268_v57  ;;  %v236_v62 = vld [vmem:[%s958_s6 + $0x30] sm:$0xff]  ;;  %v525_v63 = vpack.c.bf16 %v253_v61, %v252_v60  ;;  %v237_v0 = vld [vmem:[%s958_s6 + $0x38] sm:$0xff]  ;;  %v270_v2 = vld [vmem:[%s959_s7 + $0xa0] sm:$0xff]  ;;  %vm227_vm8 = vcmask 259076  }
   0x9   :  { %v46_v10 = vcombine.high %v45_v8, %v45_v8  ;;  %v50_v11 = vsel %vm49_vm0, %v45_v8, 0.0  ;;  %v64_v12 = vcombine.high %v63_v9, %v63_v9  ;;  %v67_v14 = vsel %vm49_vm0, %v63_v9, 0.0  ;;  %522 = vmatpush3.bf16.msra.mxu0 %v521_v55  ;;  %v271_v4 = vld [vmem:[%s959_s7 + $0xa8] sm:$0xff]  ;;  %v238_v9 = vld [vmem:[%s958_s6 + $0x40] sm:$0xff]  ;;  %v240_v18 = vld [vmem:[%s958_s6 + $0x50] sm:$0xff] }
   0xa   :  { %v731_v30 = vsub.s32 %v77_v28, %v698_v3  ;;  %524 = vmatprep.subr.bf16.mxu0 %v523_v59  ;;  %v561_v1 = vpack.c.bf16 %v237_v0, %v236_v62  ;;  %v255_v8 = vld [vmem:[%s959_s7 + $0x28] sm:$0xff]  ;;  %v241_v19 = vld [vmem:[%s958_s6 + $0x58] sm:$0xff]  ;;  %v274_v23 = vld [vmem:[%s959_s7 + $0xc0] sm:$0xff] }
   0xb   :  { %v52_v13 = vsel %vm51_vm1, %v46_v10, 0.0  ;;  %v68_v15 = vsel %vm49_vm0, %v64_v12, 0.0  ;;  %556 = vmatpush1.bf16.msra.mxu1 %v555_v24  ;;  %v567_v22 = vpack.c.bf16 %v241_v19, %v240_v18  ;;  %v275_v24 = vld [vmem:[%s959_s7 + $0xc8] sm:$0xff]  ;;  %v258_v25 = vld [vmem:[%s959_s7 + $0x40] sm:$0xff]  ;;  %v280_v53 = vld [vmem:[%s959_s7 + $0xf0] sm:$0xff] }
   0xc   :  { %v53_v16 = vadd.f32 %v52_v13, %v50_v11  ;;  %v69_v17 = vadd.f32 %v68_v15, %v67_v14  ;;  %557 = vmatprep.subr.bf16.mxu1 %v638_v21  ;;  %v239_v11 = vld [vmem:[%s958_s6 + $0x48] sm:$0xff]  ;;  %v272_v13 = vld [vmem:[%s959_s7 + $0xb0] sm:$0xff]  ;;  %v273_v14 = vld [vmem:[%s959_s7 + $0xb8] sm:$0xff]  ;;  %v535_v26 = vpack.c.bf16 %v275_v24, %v274_v23 }
   0xd   :  { %526 = vmatpush3.bf16.msra.mxu0 %v525_v63  ;;  %v564_v12 = vpack.c.bf16 %v239_v11, %v238_v9  ;;  %v256_v15 = vld [vmem:[%s959_s7 + $0x30] sm:$0xff]  ;;  %v242_v28 = vld [vmem:[%s958_s6 + $0x60] sm:$0xff]  ;;  %v263_v48 = vld [vmem:[%s959_s7 + $0x68] sm:$0xff] }
   0xe   :  { %54 = vadd.xlane.f32.xlu0 %v53_v16  ;;  %v531_v16 = vpack.c.bf16 %v273_v14, %v272_v13  ;;  %v246_v49 = vld [vmem:[%s958_s6 + $0x80] sm:$0xff]  ;;  %v247_v50 = vld [vmem:[%s958_s6 + $0x88] sm:$0xff]  ;;  %v281_v54 = vld [vmem:[%s959_s7 + $0xf8] sm:$0xff] }
   0xf   :  { %559 = vmatpush1.bf16.msra.mxu1 %v558_v56  ;;  %v576_v52 = vpack.c.bf16 %v247_v50, %v246_v49  ;;  %v547_v55 = vpack.c.bf16 %v281_v54, %v280_v53  ;;  %v264_v56 = vld [vmem:[%s959_s7 + $0x70] sm:$0xff]  ;;  %v265_v57 = vld [vmem:[%s959_s7 + $0x78] sm:$0xff]  ;;  %v153_v9 = vld [vmem:[%s956_s4] sm:$0x3] }
  0x10   :  { %560 = vmatprep.subr.bf16.mxu1 %v638_v21  ;;  %v248_v58 = vld [vmem:[%s958_s6 + $0x90] sm:$0xff]  ;;  %v549_v59 = vpack.c.bf16 %v265_v57, %v264_v56  ;;  %v249_v60 = vld [vmem:[%s958_s6 + $0x98] sm:$0xff]  ;;  %vm215_vm3 = vmor %vm214_vm2, %vm49_vm0 }
  0x11   :  { %v579_v61 = vpack.c.bf16 %v249_v60, %v248_v58  ;;  %vm226_vm7 = vmor %vm225_vm6, %vm224_vm5 }
  0x12   :  { %70 = vadd.xlane.f32.xlu0 %v69_v17  ;;  %v257_v17 = vld [vmem:[%s959_s7 + $0x38] sm:$0xff]  ;;  %vm228_vm9 = vmor %vm227_vm8, %vm226_vm7 }
  0x13   :  { %562 = vmatpush1.bf16.msra.mxu1 %v561_v1  ;;  %v533_v20 = vpack.c.bf16 %v257_v17, %v256_v15 }
  0x14   :  { %563 = vmatprep.subr.bf16.mxu1 %v638_v21 }
  0x17   :  { %565 = vmatpush1.bf16.msra.mxu1 %v564_v12 }
  0x18   :  { %566 = vmatprep.subr.bf16.mxu1 %v638_v21 }
  0x1b   :  { %568 = vmatpush1.bf16.msra.mxu1 %v567_v22 }
  0x1c   :  { %569 = vmatprep.subr.bf16.mxu1 %v638_v21 }
  0x9b   :  { %v55_v27 = vpop.xlane.xlu0 %54 }
  0x9f   :  { %v71_v29 = vpop.xlane.xlu0 %70 }
  0xa0   :  { %v72_v31 = vadd.f32 %v71_v29, %v55_v27  ;;  %v259_v27 = vld [vmem:[%s959_s7 + $0x48] sm:$0xff] }
  0xa1   :  { %v243_v29 = vld [vmem:[%s958_s6 + $0x68] sm:$0xff] }
  0xa2   :  { %v73_v32 = vmul.f32 0.0024038462, %v72_v31  ;;  %v276_v31 = vld [vmem:[%s959_s7 + $0xd0] sm:$0xff] }
  0xa4   :  { %v81_v33 = vrot.slane %v73_v32, %v731_v30  ;;  %v277_v32 = vld [vmem:[%s959_s7 + $0xd8] sm:$0xff] }
  0xa6   :  { %v734_v34 = vsub.f32 %v36_v5, %v81_v33  ;;  %v736_v35 = vsub.f32 %v37_v6, %v81_v33  ;;  %v527_v5 = vpack.c.bf16 %v271_v4, %v270_v2  ;;  %v254_v6 = vld [vmem:[%s959_s7 + $0x20] sm:$0xff]  ;;  %v537_v33 = vpack.c.bf16 %v259_v27, %v258_v25 }
  0xa7   :  { %v529_v10 = vpack.c.bf16 %v255_v8, %v254_v6  ;;  %v137_v4 = vsub.s32 0, %v698_v3  ;;  %v133_v6 = vld [vmem:[%s954_s2] sm:$0x3]  ;;  %s640_s2 = smov 32  }
  0xa8   :  { %v85_v36 = vmul.f32 %v734_v34, %v734_v34  ;;  %v102_v37 = vmul.f32 %v736_v35, %v736_v35  ;;  %528 = vmatprep.subr.bf16.mxu0 %v527_v5  ;;  %v141_v5 = vsub.s32 1, %v698_v3  ;;  %v194_v8 = vld [vmem:[%s957_s5] sm:$0x3] }
  0xa9   :  { %530 = vmatpush3.bf16.msra.mxu0 %v529_v10  ;;  %v138_v3 = vrot.slane %v133_v6, %v137_v4  ;;  %v199_v13 = vrot.slane %v194_v8, %v137_v4  ;;  %v158_v15 = vrot.slane %v153_v9, %v137_v4 }
  0xaa   :  { %v93_v38 = vrot.slane %v85_v36, %v707_v7  ;;  %v110_v39 = vrot.slane %v102_v37, %v707_v7  ;;  %532 = vmatprep.subr.bf16.mxu0 %v531_v16  ;;  %v570_v36 = vpack.c.bf16 %v243_v29, %v242_v28  ;;  %v539_v37 = vpack.c.bf16 %v277_v32, %v276_v31 }
  0xab   :  { %v142_v12 = vrot.slane %v133_v6, %v141_v5  ;;  %v203_v14 = vrot.slane %v194_v8, %v141_v5  ;;  %v162_v16 = vrot.slane %v153_v9, %v141_v5 }
  0xac   :  { %v94_v40 = vcombine.high %v93_v38, %v93_v38  ;;  %v111_v41 = vcombine.high %v110_v39, %v110_v39  ;;  %v97_v42 = vsel %vm49_vm0, %v93_v38, 0.0  ;;  %v114_v46 = vsel %vm49_vm0, %v110_v39, 0.0  ;;  %v260_v38 = vld [vmem:[%s959_s7 + $0x50] sm:$0xff]  ;;  %v261_v39 = vld [vmem:[%s959_s7 + $0x58] sm:$0xff]  ;;  %571 = vmatpush1.bf16.msra.mxu1 %v570_v36 }
  0xad   :  { %534 = vmatpush3.bf16.msra.mxu0 %v533_v20  ;;  %572 = vmatprep.subr.bf16.mxu1 %v638_v21  ;;  %v143_v18 = vcombine.low %v138_v3, %v142_v12  ;;  %v204_v19 = vcombine.low %v199_v13, %v203_v14  ;;  %v163_v20 = vcombine.low %v158_v15, %v162_v16 }
  0xae   :  { %v98_v43 = vsel %vm51_vm1, %v94_v40, 0.0  ;;  %v115_v45 = vsel %vm49_vm0, %v111_v41, 0.0  ;;  %536 = vmatprep.subr.bf16.mxu0 %v535_v26  ;;  %v244_v40 = vld [vmem:[%s958_s6 + $0x70] sm:$0xff]  ;;  %v245_v41 = vld [vmem:[%s958_s6 + $0x78] sm:$0xff] }
  0xaf   :  { %v99_v44 = vadd.f32 %v98_v43, %v97_v42  ;;  %v116_v47 = vadd.f32 %v115_v45, %v114_v46  ;;  %v278_v42 = vld [vmem:[%s959_s7 + $0xe0] sm:$0xff]  ;;  %v279_v43 = vld [vmem:[%s959_s7 + $0xe8] sm:$0xff]  ;;  %v573_v45 = vpack.c.bf16 %v245_v41, %v244_v40  ;;  %v150_v25 = vrot.slane %v143_v18, %v707_v7 }
  0xb0   :  { %v543_v46 = vpack.c.bf16 %v279_v43, %v278_v42  ;;  %v211_v26 = vrot.slane %v204_v19, %v707_v7  ;;  %v170_v29 = vrot.slane %v163_v20, %v707_v7 }
  0xb1   :  { %100 = vadd.xlane.f32.xlu1 %v99_v44  ;;  %538 = vmatpush3.bf16.msra.mxu0 %v537_v33  ;;  %v541_v44 = vpack.c.bf16 %v261_v39, %v260_v38 }
  0xb2   :  { %540 = vmatprep.subr.bf16.mxu0 %v539_v37  ;;  %574 = vmatpush1.bf16.msra.mxu1 %v573_v45 }
  0xb3   :  { %575 = vmatprep.subr.bf16.mxu1 %v638_v21 }
  0xb5   :  { %117 = vadd.xlane.f32.xlu1 %v116_v47  ;;  %v262_v47 = vld [vmem:[%s959_s7 + $0x60] sm:$0xff]  ;;  %542 = vmatpush3.bf16.msra.mxu0 %v541_v44 }
  0xb6   :  { %v545_v51 = vpack.c.bf16 %v263_v48, %v262_v47  ;;  %544 = vmatprep.subr.bf16.mxu0 %v543_v46  ;;  %577 = vmatpush1.bf16.msra.mxu1 %v576_v52 }
  0xb7   :  { %578 = vmatprep.subr.bf16.mxu1 %v638_v21  ;;  %v174_v21 = vld [vmem:[%s955_s3] sm:$0x3]  ;;  %s641_s3 = smov [#allocation2]  }
  0xb8   :  { %v179_v10 = vrot.slane %v174_v21, %v137_v4  ;;  %v183_v11 = vrot.slane %v174_v21, %v141_v5  ;;  %s460_s4 = sshll.u32 %s641_s3, 4  ;;  %s461_s4 = int_to_ptr.vmem [resolvable:$true] %s460_s4 }
  0xb9   :  { %546 = vmatpush3.bf16.msra.mxu0 %v545_v51  ;;  %s589_s5 = scalar_lea.vmem %s461_s4, 128  ;;  %p594_p1 = scmp.lt.s32.totalorder %s461_s4, %s461_s4 }
  0xba   :  { %548 = vmatprep.subr.bf16.mxu0 %v547_v55  ;;  %580 = vmatpush1.bf16.msra.mxu1 %v579_v61  ;;  %v184_v17 = vcombine.low %v179_v10, %v183_v11  ;;  %p590_p0 = scmp.ne.s32.totalorder %s461_s4, %s589_s5  ;;  %p595_p2 = scmp.lt.s32.totalorder %s589_s5, %s589_s5 }
  0xbc   :  { %v191_v24 = vrot.slane %v184_v17, %v707_v7  ;;  %p596_p3 = por %p595_p2, %p594_p1 }
  0xbd   :  { %550 = vmatpush3.bf16.msra.mxu0 %v549_v59 }
  0xbe   :  { %p597_p4 = pnand %p596_p3, %p590_p0 }
 0x13e   :  { %v101_v62 = vpop.xlane.xlu1 %100 }
 0x142   :  { %v118_v63 = vpop.xlane.xlu1 %117 }
 0x143   :  { %v119_v0 = vadd.f32 %v118_v63, %v101_v62 }
 0x145   :  { %v120_v1 = vmul.f32 0.0024038462, %v119_v0 }
 0x147   :  { %v121_v2 = vadd.f32 1e-05, %v120_v1 }
 0x149   :  { %587 = vrsqrt.f32 %v121_v2 }
 0x153   :  { %v588_v22 = vpop.eup %587 }
 0x154   :  { %v130_v23 = vrot.slane %v588_v22, %v731_v30 }
 0x156   :  { %v173_v27 = vmul.f32 %v130_v23, %v736_v35  ;;  %v132_v28 = vmul.f32 %v130_v23, %v734_v34 }
 0x158   :  { %v193_v31 = vmul.f32 %v191_v24, %v173_v27  ;;  %v152_v32 = vmul.f32 %v150_v25, %v132_v28 }
 0x15a   :  { %v213_v33 = vadd.f32 %v211_v26, %v193_v31  ;;  %v172_v36 = vadd.f32 %v170_v29, %v152_v32 }
 0x15c   :  { %218 = vrot.lane.b32.xlu0 %v213_v33, %s640_s2  ;;  %v288_v30 = vrot.slane %v213_v33, %v707_v7  ;;  %v369_v37 = vrot.slane %v172_v36, %v707_v7  ;;  %216 = vst.msk [vmem:[#allocation2] sm:$0xf] %vm215_vm3, %v172_v36 }
 0x15e   :  { %v289_v35 = vcombine.high %v288_v30, %v288_v30  ;;  %v370_v38 = vcombine.high %v369_v37, %v369_v37 }
 0x160   :  { %356 = vmatprep.mubr.f32.mxu0 %v289_v35  ;;  %482 = vmatprep.mubr.msk.f32.mxu1 %vm221_vm4, %v370_v38 }
 0x161   :  { %357 = vmatmul.mubr.f32.vlgmr.msra.gmra.mrb[0].mxu0 %v288_v30  ;;  %439 = vmatmul.mubr.f32.vlgmr.msra.gmra.mrb[0].mxu1 %v369_v37 }
 0x1ce   :  { %v219_v34 = vpop.permute.xlu0 %218 }
 0x1cf   :  { %v220_v39 = vrot.slane %v219_v34, 6 }
 0x1d1   :  { %v222_v7 = vsel %vm221_vm4, %v220_v39, %v219_v34 }
 0x1d2   :  { %229 = vst.msk [vmem:[#allocation2 + $0x2] sm:$0x3f] %vm228_vm9, %v222_v7 }
 0x1d3   :  { %600 = shalt.err (!%p597_p4)
}
 0x1d4   :  { %s601_s17 = scalar_lea.hbm %s961_s9, 128 }
 0x1d5   :  { %p602_p5 = scmp.ne.s32.totalorder %s961_s9, %s601_s17  ;;  %p605_p6 = scmp.lt.u32.totalorder %s601_s17, %s961_s9 }
 0x1d7   :  { %p607_p7 = pnand %p605_p6, %p602_p5 }
 0x1d9   :  { %610 = shalt.err (!%p607_p7)
}
 0x1da   :  { %463 = dma.vmem_to_hbm [thread:$0]  %s461_s4, 128, %s961_s9, [#allocation3]   ;;  %v483_v45 = vld [vmem:[%s960_s8] ss:$0 sm:$0xff]  ;;  %vm452_vm10 = vcmask 9216  }
 0x1db   :  { %s642_s26 = smov [#allocation4]  }
 0x1dc   :  { %s470_s27 = sshll.u32 %s642_s26, 4  ;;  %s471_s27 = int_to_ptr.vmem [resolvable:$true] %s470_s27 }
 0x1dd   :  { %s611_s28 = scalar_lea.vmem %s471_s27, 32  ;;  %p616_p9 = scmp.lt.s32.totalorder %s471_s27, %s471_s27 }
 0x1de   :  { %p612_p8 = scmp.ne.s32.totalorder %s471_s27, %s611_s28  ;;  %p617_p10 = scmp.lt.s32.totalorder %s611_s28, %s611_s28 }
 0x1e0   :  { %p618_p11 = por %p617_p10, %p616_p9 }
 0x1e2   :  { %p619_p12 = pnand %p618_p11, %p612_p8 }
 0x234   :  { %v516_v40 = vpop.f32.mrb[0].mxu0  ;;  %v440_v41 = vpop.f32.mrb[0].mxu1 }
 0x235   :  { %v517_v42 = vpop.f32.mrb[1].mxu0  ;;  %v442_v43 = vpop.f32.mrb[1].mxu1 }
 0x236   :  { %v518_v44 = vadd.f32 %v517_v42, %v516_v40 }
 0x238   :  { %v441_v46 = vadd.f32 %v518_v44, %v440_v41 }
 0x23a   :  { %v451_v47 = vadd.f32 %v483_v45, %v441_v46 }
 0x23c   :  { %453 = vst.msk [vmem:[#allocation4] sm:$0x3] %vm452_vm10, %v451_v47 }
 0x23d   :  { %622 = shalt.err (!%p619_p12)
}
 0x23e   :  { %s623_s30 = scalar_lea.hbm %s962_s10, 32 }
 0x23f   :  { %p624_p13 = scmp.ne.s32.totalorder %s962_s10, %s623_s30  ;;  %p627_p0 = scmp.lt.u32.totalorder %s623_s30, %s962_s10 }
 0x241   :  { %p629_p1 = pnand %p627_p0, %p624_p13 }
 0x243   :  { %632 = shalt.err (!%p629_p1)
}
 0x244   :  { %473 = dma.vmem_to_hbm [thread:$0]  %s471_s27, 32, %s962_s10, [#allocation5]  }
 0x245   :  { %633 = dma.done.wait [#allocation3], 128  }
 0x246   :  { %634 = vsyncadd [#allocation3], 4294967168 }
 0x247   :  { %635 = dma.done.wait [#allocation5], 32  }
 0x248   :  { %636 = vsyncadd [#allocation5], 4294967264 }
 0x249   :  { %480 = vsyncpa [#allocation3], 1 }
 0x24a   :  { %481 = vsyncpa [#allocation5], 1 }

</bundles_post_ra>
